<compile_context>
chip_gen: v7x
topology: tpu7x:2x2x1
jax: 0.10.0
libtpu: 0.0.40
codegen_flags: <defaults>
</compile_context>

<pallas_src>
import jax
import jax.numpy as jnp
from jax.experimental import pallas as pl
from jax.experimental.pallas import tpu as pltpu


def _round_up(a, m):
    return (a + m - 1) // m * m


def _outconv_kernel(x_ref, w_ref, b_ref, o_ref):
    # x_ref: (NB, Cin, THW)   channel-major pixel tile(s), HW on lanes
    # w_ref: (Cout, Cin)      grid-invariant weight
    # b_ref: (Cout, 1)        grid-invariant bias (broadcasts along lanes)
    # o_ref: (NB, Cout, THW)  lane-dense output tile(s)
    w = w_ref[...]
    b = b_ref[...]
    for i in range(o_ref.shape[0]):          # NB is small and static
        acc = jnp.dot(w, x_ref[i], preferred_element_type=jnp.float32)
        o_ref[i] = (acc + b).astype(o_ref.dtype)


def _pick_tiling(n, hw, cin, cout, dtype, *,
                 target_lanes=32 * 1024,
                 vmem_budget_bytes=40 * 1024 * 1024,
                 step_bytes_target=4 * 1024 * 1024,
                 max_nb=16):
    """Choose (images-per-step NB, pixel tile tile_hw).

    tile_hw: largest multiple of 128 lanes <= target that keeps the
    double-buffered in+out tiles within the VMEM budget, with channel dims
    rounded up to the physical sublane tile (8 rows for f32, 16 for bf16).
    NB > 1 only when one tile already covers the whole image, so small-HW
    problems still move ~MiBs per grid step.
    """
    itemsize = jnp.dtype(dtype).itemsize
    sub = (8 * 4) // itemsize                         # sublane tile rows
    # Double-buffered in+out bytes per lane per image, sublane-padded channels.
    bpl = 2 * (_round_up(cin, sub) + _round_up(cout, sub)) * itemsize

    hw_128 = _round_up(hw, 128)
    budget_lanes = max(128, (vmem_budget_bytes // bpl) // 128 * 128)
    tile_hw = max(128, min(hw_128, target_lanes, budget_lanes))

    nb = 1
    if tile_hw >= hw_128 and n > 1:
        per_image = bpl * tile_hw                     # double-buffered bytes
        nb = int(min(n, max_nb,
                     max(1, step_bytes_target // per_image),
                     max(1, vmem_budget_bytes // per_image)))

    # v7x megacore: if the grid would collapse to a single step while each
    # step still moves nontrivial data, split the pixel axis so both
    # TensorCores (and the input/output pipeline) have work.
    if nb == 1:
        while (pl.cdiv(n, nb) * pl.cdiv(hw, tile_hw)) < 2 \
                and (bpl * tile_hw) > (4 * 1024 * 1024) and tile_hw > 128:
            tile_hw = max(128, (tile_hw // 2) // 128 * 128)

    return int(nb), int(tile_hw)


def outconv_pallas(x_nchw, weight, bias, *, tile_hw=None, nb=None,
                   vmem_budget_bytes=40 * 1024 * 1024,
                   vmem_limit_bytes=48 * 1024 * 1024):
    """1x1 Conv2d forward (PyTorch OutConv semantics).

    x_nchw : (N, Cin, H, W) float32
    weight : (Cout, Cin, 1, 1) float32  (PyTorch Conv2d weight layout)
    bias   : (Cout,) float32
    returns: (N, Cout, H, W) float32
    """
    n, cin, h, w = x_nchw.shape
    cout = weight.shape[0]
    hw = h * w

    # Free reshapes only — no transposes, no extra HBM passes.
    x3 = x_nchw.reshape(n, cin, hw)          # (N, Cin, HW)
    w_mat = weight.reshape(cout, cin)        # (Cout, Cin)
    b_col = bias.reshape(cout, 1)            # (Cout, 1)

    auto_nb, auto_tile = _pick_tiling(n, hw, cin, cout, x_nchw.dtype,
                                      vmem_budget_bytes=vmem_budget_bytes)
    if tile_hw is None:
        tile_hw = auto_tile
    if nb is None:
        nb = auto_nb

    # cdiv grid; ragged last blocks (pixel or batch axis) are handled by the
    # Pallas pipeline: OOB reads are unused garbage lanes, OOB writes dropped.
    grid = (pl.cdiv(n, nb), pl.cdiv(hw, tile_hw))

    out = pl.pallas_call(
        _outconv_kernel,
        out_shape=jax.ShapeDtypeStruct((n, cout, hw), x_nchw.dtype),
        grid_spec=pltpu.PrefetchScalarGridSpec(
            num_scalar_prefetch=0,
            grid=grid,
            in_specs=[
                pl.BlockSpec((nb, cin, tile_hw), lambda i, j: (i, 0, j)),
                pl.BlockSpec((cout, cin), lambda i, j: (0, 0)),
                pl.BlockSpec((cout, 1), lambda i, j: (0, 0)),
            ],
            out_specs=pl.BlockSpec((nb, cout, tile_hw), lambda i, j: (i, 0, j)),
        ),
        compiler_params=pltpu.CompilerParams(
            dimension_semantics=("parallel", "parallel"),
            vmem_limit_bytes=vmem_limit_bytes,
        ),
    )(x3, w_mat, b_col)

    return out.reshape(n, cout, h, w)


if __name__ == "__main__":
    key = jax.random.PRNGKey(0)
    k_x, k_w, k_b = jax.random.split(key, 3)

    N, CIN, COUT, H, W = 2, 4, 3, 16, 16

    x = jax.random.normal(k_x, (N, CIN, H, W), dtype=jnp.float32)
    # Deterministic synthetic parameters (Conv2d(in=4, out=3, kernel_size=1)):
    weight = jax.random.normal(k_w, (COUT, CIN, 1, 1), dtype=jnp.float32) * 0.1
    bias = jax.random.normal(k_b, (COUT,), dtype=jnp.float32) * 0.1

    y = jax.block_until_ready(outconv_pallas(x, weight, bias))

    # Reference check with plain JAX (einsum over channels + bias broadcast).
    y_ref = jnp.einsum("nchw,oc->nohw", x, weight.reshape(COUT, CIN)) \
        + bias.reshape(1, COUT, 1, 1)
    assert y.shape == (N, COUT, H, W)
    assert jnp.allclose(y, y_ref, atol=1e-5, rtol=1e-5)

    print("KERNEL_OK")
</pallas_src>

<mosaic_0001>
module attributes {stable_mosaic.version = 11 : i64} {
  func.func @_outconv_kernel(%arg0: i32, %arg1: i32, %arg2: memref<2x4x256xf32, #tpu.memory_space<vmem>>, %arg3: memref<3x4xf32, #tpu.memory_space<vmem>>, %arg4: memref<3x1xf32, #tpu.memory_space<vmem>>, %arg5: memref<2x3x256xf32, #tpu.memory_space<vmem>>) attributes {dimension_semantics = [#tpu.dimension_semantics<parallel>, #tpu.dimension_semantics<parallel>], iteration_bounds = array<i64: 1, 1>, scalar_prefetch = 0 : i64, scratch_operands = 0 : i64, tpu.core_type = #tpu.core_type<tc>, window_params = [{transform_indices = @transform_0, window_bounds = array<i64: 2, 4, 256>}, {pipeline_mode = #tpu.pipeline_mode<synchronous>, transform_indices = @transform_1, window_bounds = array<i64: 3, 4>}, {pipeline_mode = #tpu.pipeline_mode<synchronous>, transform_indices = @transform_2, window_bounds = array<i64: 3, 1>}, {transform_indices = @transform_3, window_bounds = array<i64: 2, 3, 256>}]} {
    %c0 = arith.constant 0 : index
    %c0_0 = arith.constant 0 : index
    %0 = vector.load %arg3[%c0, %c0_0] : memref<3x4xf32, #tpu.memory_space<vmem>>, vector<3x4xf32>
    %c0_1 = arith.constant 0 : index
    %c0_2 = arith.constant 0 : index
    %1 = vector.load %arg4[%c0_1, %c0_2] : memref<3x1xf32, #tpu.memory_space<vmem>>, vector<3x1xf32>
    %c0_3 = arith.constant 0 : index
    %c0_4 = arith.constant 0 : index
    %c0_5 = arith.constant 0 : index
    %2 = vector.load %arg2[%c0_3, %c0_4, %c0_5] : memref<2x4x256xf32, #tpu.memory_space<vmem>>, vector<1x4x256xf32>
    %3 = vector.shape_cast %2 : vector<1x4x256xf32> to vector<4x256xf32>
    %cst = arith.constant dense<0.000000e+00> : vector<3x256xf32>
    %4 = tpu.matmul %0, %3, %cst {dimension_numbers = #tpu.dot_dimension_numbers<[1], [0], [0], [1], [0, 0, 1, 1], [], []>} : vector<3x4xf32>, vector<4x256xf32>, vector<3x256xf32> -> vector<3x256xf32>
    %5 = vector.broadcast %1 : vector<3x1xf32> to vector<3x256xf32>
    %6 = arith.addf %4, %5 : vector<3x256xf32>
    %c0_6 = arith.constant 0 : index
    %c0_7 = arith.constant 0 : index
    %c0_8 = arith.constant 0 : index
    %7 = vector.load %arg5[%c0_6, %c0_7, %c0_8] : memref<2x3x256xf32, #tpu.memory_space<vmem>>, vector<1x3x256xf32>
    %8 = vector.shape_cast %7 : vector<1x3x256xf32> to vector<3x256xf32>
    %9 = vector.shape_cast %6 : vector<3x256xf32> to vector<1x3x256xf32>
    tpu.vector_store %arg5[%c0_6, %c0_7, %c0_8], %9 {strides = array<i32>} : memref<2x3x256xf32, #tpu.memory_space<vmem>>, vector<1x3x256xf32>,
    %c1 = arith.constant 1 : index
    %c0_9 = arith.constant 0 : index
    %c0_10 = arith.constant 0 : index
    %10 = vector.load %arg2[%c1, %c0_9, %c0_10] : memref<2x4x256xf32, #tpu.memory_space<vmem>>, vector<1x4x256xf32>
    %11 = vector.shape_cast %10 : vector<1x4x256xf32> to vector<4x256xf32>
    %cst_11 = arith.constant dense<0.000000e+00> : vector<3x256xf32>
    %12 = tpu.matmul %0, %11, %cst_11 {dimension_numbers = #tpu.dot_dimension_numbers<[1], [0], [0], [1], [0, 0, 1, 1], [], []>} : vector<3x4xf32>, vector<4x256xf32>, vector<3x256xf32> -> vector<3x256xf32>
    %13 = vector.broadcast %1 : vector<3x1xf32> to vector<3x256xf32>
    %14 = arith.addf %12, %13 : vector<3x256xf32>
    %c1_12 = arith.constant 1 : index
    %c0_13 = arith.constant 0 : index
    %c0_14 = arith.constant 0 : index
    %15 = vector.load %arg5[%c1_12, %c0_13, %c0_14] : memref<2x3x256xf32, #tpu.memory_space<vmem>>, vector<1x3x256xf32>
    %16 = vector.shape_cast %15 : vector<1x3x256xf32> to vector<3x256xf32>
    %17 = vector.shape_cast %14 : vector<3x256xf32> to vector<1x3x256xf32>
    tpu.vector_store %arg5[%c1_12, %c0_13, %c0_14], %17 {strides = array<i32>} : memref<2x3x256xf32, #tpu.memory_space<vmem>>, vector<1x3x256xf32>,
    return
  }
  func.func @transform_0(%arg0: i32, %arg1: i32) -> (i32, i32, i32) {
    %c0_i32 = arith.constant 0 : i32
    %c0_i32_0 = arith.constant 0 : i32
    return %arg0, %c0_i32, %arg1 : i32, i32, i32
  }
  func.func @transform_1(%arg0: i32, %arg1: i32) -> (i32, i32) {
    %c0_i32 = arith.constant 0 : i32
    %c0_i32_0 = arith.constant 0 : i32
    %c0_i32_1 = arith.constant 0 : i32
    return %c0_i32, %c0_i32_0 : i32, i32
  }
  func.func @transform_2(%arg0: i32, %arg1: i32) -> (i32, i32) {
    %c0_i32 = arith.constant 0 : i32
    %c0_i32_0 = arith.constant 0 : i32
    %c0_i32_1 = arith.constant 0 : i32
    return %c0_i32, %c0_i32_0 : i32, i32
  }
  func.func @transform_3(%arg0: i32, %arg1: i32) -> (i32, i32, i32) {
    %c0_i32 = arith.constant 0 : i32
    %c0_i32_0 = arith.constant 0 : i32
    return %arg0, %c0_i32, %arg1 : i32, i32, i32
  }
}

</mosaic_0001>

<bundles_post_ra>
// kernel: tpu_custom_call.1
= control target key start
LH: loop header
LB: loop body
LE: loop exit
PB: predicated region body
PF: predicated region fallthrough
CT: control target
= control target key end

     0   :  { %8 = vsyncpa [#allocation3], 0  ;;  %s252_s12 = smov [#allocation2]   ;;  %s301_s0 = inlined_call_operand.hbm [shape: f32[2,4,256], index: 0, kind: input, shape index: {}]   ;;  %s302_s1 = inlined_call_operand.vmem [shape: f32[3,4], index: 1, kind: input, shape index: {}]   ;;  %s303_s2 = inlined_call_operand.vmem [shape: f32[3,1], index: 2, kind: input, shape index: {}]   ;;  %s304_s3 = inlined_call_operand.vmem [shape: f32[2,3,256], index: 3, kind: output, shape index: {}]  }
   0x1   :  { %s14_s13 = sshll.u32 %s252_s12, 4  ;;  %s228_s16 = scalar_lea.hbm %s301_s0, 256  ;;  %s15_s13 = int_to_ptr.vmem [resolvable:$true] %s14_s13 }
   0x2   :  { %p229_p0 = scmp.ne.s32.totalorder %s301_s0, %s228_s16  ;;  %p232_p1 = scmp.lt.u32.totalorder %s228_s16, %s301_s0 }
   0x4   :  { %p234_p2 = pnand %p232_p1, %p229_p0 }
   0x6   :  { %237 = shalt.err (!%p234_p2)
}
   0x7   :  { %s238_s21 = scalar_lea.vmem %s15_s13, 256  ;;  %p243_p4 = scmp.lt.s32.totalorder %s15_s13, %s15_s13 }
   0x8   :  { %p239_p3 = scmp.ne.s32.totalorder %s15_s13, %s238_s21  ;;  %p244_p5 = scmp.lt.s32.totalorder %s238_s21, %s238_s21 }
   0xa   :  { %p245_p6 = por %p244_p5, %p243_p4 }
   0xc   :  { %p246_p7 = pnand %p245_p6, %p239_p3 }
   0xe   :  { %249 = shalt.err (!%p246_p7)
}
   0xf   :  { %s253_s22 = smov 128   ;;  %s254_s23 = smov 8  }
  0x10   :  { %20 = dma.hbm_to_vmem [thread:$0]  %s301_s0, 256, %s15_s13, [#allocation3], %s253_s22, %s253_s22, %s254_s23  }
  0x11   :  { %250 = dma.done.wait [#allocation3], 256  }
  0x12   :  { %251 = vsyncadd [#allocation3], 4294967040  ;;  %v255_v0 = vmov 0.0   ;;  %v256_v1 = vmov 0   ;;  %v30_v2 = vld [vmem:[#allocation2] sm:$0xff]  ;;  %vm42_vm0 = vcmask 1043456  }
  0x13   :  { %111 = vmatprep.mubr.f32.mxu0 %v255_v0  ;;  %195 = vmatprep.mubr.f32.mxu1 %v255_v0  ;;  %v124_v3 = vld [vmem:[#allocation2 + $0x8] sm:$0xff]  ;;  %v37_v4 = vcombine.high %v30_v2, %v30_v2  ;;  %v29_v6 = vld [vmem:[%s303_s2] sm:$0x7]  ;;  %vm38_vm1 = vcmask 31744  }
  0x14   :  { %225 = vset.pattern.permute.xlu0 %v256_v1  ;;  %v126_v5 = vcombine.high %v124_v3, %v124_v3  ;;  %v28_v7 = vld [vmem:[%s302_s1] sm:$0x7] }
  0x15   :  { %33 = vperm.xlu0 %225, %v29_v6   ;;  %213 = vmatprep.subr.msk.mxu0 %vm42_vm0, %v37_v4 }
  0x16   :  { %216 = vmatprep.subr.msk.mxu1 %vm42_vm0, %v126_v5  ;;  %214 = vmatpush1.msk.msra.mxu0 %vm42_vm0, %v30_v2 }
  0x17   :  { %217 = vmatpush1.msk.msra.mxu1 %vm42_vm0, %v124_v3  ;;  %215 = vmatmul.mubr.msk.f32.vlgmr.msra.gmra.mrb[0].mxu0 %vm38_vm1, %v28_v7 }
  0x18   :  { %218 = vmatmul.mubr.msk.f32.vlgmr.msra.gmra.mrb[0].mxu1 %vm38_vm1, %v28_v7 }
  0x94   :  { %v34_v8 = vpop.permute.xlu0 %33 }
  0xea   :  { %v113_v9 = vpop.f32.mrb[0].mxu0 }
  0xeb   :  { %v197_v10 = vpop.f32.mrb[0].mxu1  ;;  %v114_v11 = vadd.f32 %v113_v9, %v34_v8  ;;  %v115_v13 = vpop.f32.mrb[1].mxu0 }
  0xec   :  { %v198_v12 = vadd.f32 %v197_v10, %v34_v8  ;;  %v199_v14 = vpop.f32.mrb[1].mxu1  ;;  %v116_v15 = vadd.f32 %v115_v13, %v34_v8 }
  0xed   :  { %v200_v16 = vadd.f32 %v199_v14, %v34_v8 }
  0xee   :  { %v120_v17 = vcombine.low %v114_v11, %v116_v15 }
  0xef   :  { %v204_v18 = vcombine.low %v198_v12, %v200_v16 }
  0xf0   :  { %122 = vst [vmem:[%s304_s3] sm:$0x77] %v120_v17 }
  0xf1   :  { %219 = vst [vmem:[%s304_s3 + $0x8] sm:$0x77] %v204_v18 }
  0xf2   :  { %212 = vsyncpa [#allocation3], 1 }

</bundles_post_ra>
